<compile_context>
chip_gen: v6e
topology: v6e:2x2x1
jax: 0.10.0
libtpu: 0.0.40
codegen_flags: <defaults>
</compile_context>

<pallas_src>
import functools
import math

import jax
import jax.numpy as jnp
from jax.experimental import pallas as pl
from jax.experimental.pallas import tpu as pltpu


def _cae_kernel(x_ref, w1_ref, w2_ref, o_ref, sum_sc, max_sc, *,
                hw, chunk, needs_mask):
    # x_ref : VMEM (1, C, t)   spatial chunk of one batch element (native dtype)
    # w1_ref: VMEM (Ch, C)     fc[0] weight (1x1 conv, squeezed), f32
    # w2_ref: VMEM (C, Ch)     fc[2] weight (1x1 conv, squeezed), f32
    # o_ref : VMEM (1, C, 1)   sigmoid(fc(avg) + fc(max)) for this batch
    # sum_sc, max_sc: VMEM (C, 128) f32 lane-dense running accumulators
    s = pl.program_id(1)

    @pl.when(s == 0)
    def _init():
        sum_sc[...] = jnp.zeros_like(sum_sc)
        max_sc[...] = jnp.full_like(max_sc, -jnp.inf)

    nb = chunk // 128          # chunk is always a multiple of 128
    if needs_mask:
        lane_iota = jax.lax.broadcasted_iota(jnp.int32, sum_sc.shape, 1)  # (C,128)
        base = s * chunk

    def accum(i):
        off = i * 128
        if not isinstance(off, int):
            off = pl.multiple_of(off, 128)
        blk = x_ref[0, :, pl.ds(off, 128)].astype(jnp.float32)   # (C, 128)
        if needs_mask:
            valid = (lane_iota + (base + off)) < hw
            sum_sc[...] += jnp.where(valid, blk, 0.0)
            max_sc[...] = jnp.maximum(max_sc[...], jnp.where(valid, blk, -jnp.inf))
        else:
            sum_sc[...] += blk
            max_sc[...] = jnp.maximum(max_sc[...], blk)

    if nb <= 8:
        for i in range(nb):
            accum(i)
    else:
        def body(i, carry):
            accum(i)
            return carry
        jax.lax.fori_loop(0, nb, body, 0, unroll=math.gcd(nb, 8))

    @pl.when(s == pl.num_programs(1) - 1)
    def _finalize():
        # Single cross-lane reduce of the lane-dense accumulators.
        avg = jnp.sum(sum_sc[...], axis=-1, keepdims=True) * (1.0 / hw)   # (C, 1)
        mx = jnp.max(max_sc[...], axis=-1, keepdims=True)                 # (C, 1)
        w1 = w1_ref[...]   # (Ch, C)
        w2 = w2_ref[...]   # (C, Ch)
        h_avg = jnp.maximum(
            jnp.dot(w1, avg, preferred_element_type=jnp.float32), 0.0)    # (Ch, 1)
        h_max = jnp.maximum(
            jnp.dot(w1, mx, preferred_element_type=jnp.float32), 0.0)     # (Ch, 1)
        # w2 @ relu(h_avg) + w2 @ relu(h_max) == w2 @ (relu(h_avg) + relu(h_max))
        y = jnp.dot(w2, h_avg + h_max, preferred_element_type=jnp.float32)  # (C, 1)
        o_ref[0] = jax.nn.sigmoid(y).astype(o_ref.dtype)


def _vmem_capacity_bytes():
    try:
        cap = getattr(pltpu.get_tpu_info(), "vmem_capacity_bytes", None)
        if cap:
            return int(cap)
    except Exception:
        pass
    return 64 << 20   # conservative fallback (v7x per-core VMEM)


def _choose_chunk(hw, c, itemsize, x_budget_bytes, max_lanes=32768):
    """Largest multiple of 128 <= hw whose double-buffered (C, t) block fits budget."""
    per_lane = 2 * c * itemsize                       # double-buffered bytes / lane
    t = max(128, (x_budget_bytes // per_lane) // 128 * 128)
    t = min(t, (hw // 128) * 128, max_lanes)
    if t > 2048:
        t = (t // 1024) * 1024                        # keep t/128 a multiple of 8
    return t


def channel_attention_enhancement(x, fc1_w, fc2_w, *, chunk_lanes=None):
    """x: (B, C, H, W) in native dtype (f32/bf16/f16).
    fc1_w: (C//16, C, 1, 1), fc2_w: (C, C//16, 1, 1) (PyTorch conv layout).
    Returns (B, C, 1, 1) in x.dtype."""
    B, C, H, W = x.shape
    HW = H * W
    Ch = fc1_w.shape[0]

    w1 = fc1_w.reshape(Ch, C).astype(jnp.float32)    # (Ch, C)
    w2 = fc2_w.reshape(C, Ch).astype(jnp.float32)    # (C, Ch)
    x3 = x.reshape(B, C, HW)                         # native dtype, no upcast

    itemsize = jnp.dtype(x3.dtype).itemsize

    # Very small spatial extents: pad to one 128-lane block (tiny copy); the
    # in-kernel mask (against the *original* HW) keeps sum/max exact.
    if HW < 128:
        x3 = jnp.pad(x3, ((0, 0), (0, 0), (0, 128 - HW)))
        hw_arr = 128
    else:
        hw_arr = HW

    vmem_cap = _vmem_capacity_bytes()
    x_budget = min(vmem_cap // 2, 32 << 20)          # bytes for x double-buffer
    if chunk_lanes is None:
        t = _choose_chunk(hw_arr, C, itemsize, x_budget)
    else:
        t = max(128, min(((chunk_lanes + 127) // 128) * 128,
                         (hw_arr // 128) * 128))

    n_chunks = pl.cdiv(hw_arr, t)
    needs_mask = (HW % t) != 0

    x_block_bytes = C * t * itemsize
    vmem_limit = int(min(vmem_cap, 2 * x_block_bytes + (16 << 20)))

    cost = pl.CostEstimate(
        flops=2 * B * C * HW + 8 * B * C * Ch,
        transcendentals=B * C,
        bytes_accessed=itemsize * B * C * HW + 4 * (2 * C * Ch + B * C),
    )

    kern = functools.partial(_cae_kernel, hw=HW, chunk=t, needs_mask=needs_mask)

    out = pl.pallas_call(
        kern,
        out_shape=jax.ShapeDtypeStruct((B, C, 1), x.dtype),
        grid_spec=pltpu.PrefetchScalarGridSpec(
            num_scalar_prefetch=0,
            grid=(B, n_chunks),
            in_specs=[
                pl.BlockSpec((1, C, t), lambda b, s: (b, 0, s)),   # x chunk
                pl.BlockSpec((Ch, C), lambda b, s: (0, 0)),        # fc1 weight
                pl.BlockSpec((C, Ch), lambda b, s: (0, 0)),        # fc2 weight
            ],
            out_specs=pl.BlockSpec((1, C, 1), lambda b, s: (b, 0, 0)),
            scratch_shapes=[
                pltpu.VMEM((C, 128), jnp.float32),   # lane-dense running sum
                pltpu.VMEM((C, 128), jnp.float32),   # lane-dense running max
            ],
        ),
        compiler_params=pltpu.CompilerParams(
            dimension_semantics=("parallel", "arbitrary"),
            vmem_limit_bytes=vmem_limit,
        ),
        cost_estimate=cost,
    )(x3, w1, w2)

    return out.reshape(B, C, 1, 1)


def _reference(x, fc1_w, fc2_w):
    """Pure-JAX reference mirroring the PyTorch forward."""
    B, C, H, W = x.shape
    Ch = fc1_w.shape[0]
    w1 = fc1_w.reshape(Ch, C)
    w2 = fc2_w.reshape(C, Ch)
    avg = jnp.mean(x, axis=(2, 3))   # (B, C)
    mx = jnp.max(x, axis=(2, 3))     # (B, C)

    def fc(v):
        return jnp.maximum(v @ w1.T, 0.0) @ w2.T

    out = jax.nn.sigmoid(fc(avg) + fc(mx))
    return out.reshape(B, C, 1, 1)


if __name__ == "__main__":
    key = jax.random.PRNGKey(0)
    kx, k1, k2, kx2, kx3 = jax.random.split(key, 5)

    # Module hardcodes in_planes // 16, so channels must be >= 16.
    B, C = 2, 32
    Ch = C // 16

    b1 = (1.0 / C) ** 0.5
    fc1_w = jax.random.uniform(k1, (Ch, C, 1, 1), jnp.float32, -b1, b1)
    b2 = (1.0 / Ch) ** 0.5
    fc2_w = jax.random.uniform(k2, (C, Ch, 1, 1), jnp.float32, -b2, b2)

    # Case 1: 16x16 (HW=256, multiple of 128): single-chunk fast path.
    x = jax.random.normal(kx, (B, C, 16, 16), jnp.float32)
    out = jax.block_until_ready(channel_attention_enhancement(x, fc1_w, fc2_w))
    ref = _reference(x, fc1_w, fc2_w)
    assert out.shape == (B, C, 1, 1)
    assert jnp.allclose(out, ref, atol=1e-5, rtol=1e-5), \
        f"case1 err {jnp.max(jnp.abs(out - ref))}"

    # Case 1b: force two 128-lane chunks -> multi-chunk accumulator path.
    out_b = jax.block_until_ready(
        channel_attention_enhancement(x, fc1_w, fc2_w, chunk_lanes=128))
    assert jnp.allclose(out_b, ref, atol=1e-5, rtol=1e-5), \
        f"case1b err {jnp.max(jnp.abs(out_b - ref))}"

    # Case 2: 15x15 (HW=225, not a multiple of 128): masked ragged tail.
    x2 = jax.random.normal(kx2, (B, C, 15, 15), jnp.float32)
    out2 = jax.block_until_ready(channel_attention_enhancement(x2, fc1_w, fc2_w))
    ref2 = _reference(x2, fc1_w, fc2_w)
    assert jnp.allclose(out2, ref2, atol=1e-5, rtol=1e-5), \
        f"case2 err {jnp.max(jnp.abs(out2 - ref2))}"

    # Case 3: 48x48 (HW=2304): fori_loop inner path + masked final chunk.
    x3 = jax.random.normal(kx3, (B, C, 48, 48), jnp.float32)
    out3 = jax.block_until_ready(channel_attention_enhancement(x3, fc1_w, fc2_w))
    ref3 = _reference(x3, fc1_w, fc2_w)
    assert jnp.allclose(out3, ref3, atol=1e-5, rtol=1e-5), \
        f"case3 err {jnp.max(jnp.abs(out3 - ref3))}"

    # Case 4: bf16 activations streamed natively (no wrapper upcast), f32 accum.
    xb = x.astype(jnp.bfloat16)
    out4 = jax.block_until_ready(channel_attention_enhancement(xb, fc1_w, fc2_w))
    ref4 = _reference(xb.astype(jnp.float32), fc1_w, fc2_w)
    assert out4.dtype == jnp.bfloat16
    assert jnp.allclose(out4.astype(jnp.float32), ref4, atol=2e-2, rtol=2e-2), \
        f"case4 err {jnp.max(jnp.abs(out4.astype(jnp.float32) - ref4))}"

    print("KERNEL_OK")
</pallas_src>

<mosaic_0001>
module attributes {stable_mosaic.version = 11 : i64} {
  func.func @_cae_kernel(%arg0: i32, %arg1: i32, %arg2: memref<1x32x256xf32, #tpu.memory_space<vmem>>, %arg3: memref<2x32xf32, #tpu.memory_space<vmem>>, %arg4: memref<32x2xf32, #tpu.memory_space<vmem>>, %arg5: memref<1x32x1xf32, #tpu.memory_space<vmem>>, %arg6: memref<32x128xf32, #tpu.memory_space<vmem>>, %arg7: memref<32x128xf32, #tpu.memory_space<vmem>>) attributes {dimension_semantics = [#tpu.dimension_semantics<parallel>, #tpu.dimension_semantics<arbitrary>], iteration_bounds = array<i64: 2, 1>, scalar_prefetch = 0 : i64, scratch_operands = 2 : i64, tpu.core_type = #tpu.core_type<tc>, window_params = [{transform_indices = @transform_0, window_bounds = array<i64: 1, 32, 256>}, {pipeline_mode = #tpu.pipeline_mode<synchronous>, transform_indices = @transform_1, window_bounds = array<i64: 2, 32>}, {pipeline_mode = #tpu.pipeline_mode<synchronous>, transform_indices = @transform_2, window_bounds = array<i64: 32, 2>}, {transform_indices = @transform_3, window_bounds = array<i64: 1, 32, 1>}]} {
    %c0_i32 = arith.constant 0 : i32
    %0 = arith.cmpi eq, %arg1, %c0_i32 : i32
    %1 = arith.extui %0 : i1 to i32
    %c0_i32_0 = arith.constant 0 : i32
    %2 = arith.cmpi ne, %1, %c0_i32_0 : i32
    scf.if %2 {
      %cst = arith.constant 0.000000e+00 : f32
      %22 = vector.broadcast %cst : f32 to vector<32x128xf32>
      %c0_23 = arith.constant 0 : index
      %c0_24 = arith.constant 0 : index
      %23 = vector.load %arg6[%c0_23, %c0_24] : memref<32x128xf32, #tpu.memory_space<vmem>>, vector<32x128xf32>
      tpu.vector_store %arg6[%c0_23, %c0_24], %22 {strides = array<i32>} : memref<32x128xf32, #tpu.memory_space<vmem>>, vector<32x128xf32>,
      %cst_25 = arith.constant 0xFF800000 : f32
      %24 = vector.broadcast %cst_25 : f32 to vector<32x128xf32>
      %c0_26 = arith.constant 0 : index
      %c0_27 = arith.constant 0 : index
      %25 = vector.load %arg7[%c0_26, %c0_27] : memref<32x128xf32, #tpu.memory_space<vmem>>, vector<32x128xf32>
      tpu.vector_store %arg7[%c0_26, %c0_27], %24 {strides = array<i32>} : memref<32x128xf32, #tpu.memory_space<vmem>>, vector<32x128xf32>,
    } else {
    }
    %c0 = arith.constant 0 : index
    %c0_1 = arith.constant 0 : index
    %c0_2 = arith.constant 0 : index
    %3 = vector.load %arg2[%c0, %c0_1, %c0_2] : memref<1x32x256xf32, #tpu.memory_space<vmem>>, vector<1x32x128xf32>
    %4 = vector.shape_cast %3 : vector<1x32x128xf32> to vector<32x128xf32>
    %c0_3 = arith.constant 0 : index
    %c0_4 = arith.constant 0 : index
    %5 = vector.load %arg6[%c0_3, %c0_4] : memref<32x128xf32, #tpu.memory_space<vmem>>, vector<32x128xf32>
    %6 = arith.addf %5, %4 : vector<32x128xf32>
    %c0_5 = arith.constant 0 : index
    %c0_6 = arith.constant 0 : index
    %7 = vector.load %arg6[%c0_5, %c0_6] : memref<32x128xf32, #tpu.memory_space<vmem>>, vector<32x128xf32>
    tpu.vector_store %arg6[%c0_5, %c0_6], %6 {strides = array<i32>} : memref<32x128xf32, #tpu.memory_space<vmem>>, vector<32x128xf32>,
    %c0_7 = arith.constant 0 : index
    %c0_8 = arith.constant 0 : index
    %8 = vector.load %arg7[%c0_7, %c0_8] : memref<32x128xf32, #tpu.memory_space<vmem>>, vector<32x128xf32>
    %9 = arith.maximumf %8, %4 : vector<32x128xf32>
    %c0_9 = arith.constant 0 : index
    %c0_10 = arith.constant 0 : index
    %10 = vector.load %arg7[%c0_9, %c0_10] : memref<32x128xf32, #tpu.memory_space<vmem>>, vector<32x128xf32>
    tpu.vector_store %arg7[%c0_9, %c0_10], %9 {strides = array<i32>} : memref<32x128xf32, #tpu.memory_space<vmem>>, vector<32x128xf32>,
    %c0_11 = arith.constant 0 : index
    %c0_12 = arith.constant 0 : index
    %c128 = arith.constant 128 : index
    %11 = vector.load %arg2[%c0_11, %c0_12, %c128] : memref<1x32x256xf32, #tpu.memory_space<vmem>>, vector<1x32x128xf32>
    %12 = vector.shape_cast %11 : vector<1x32x128xf32> to vector<32x128xf32>
    %c0_13 = arith.constant 0 : index
    %c0_14 = arith.constant 0 : index
    %13 = vector.load %arg6[%c0_13, %c0_14] : memref<32x128xf32, #tpu.memory_space<vmem>>, vector<32x128xf32>
    %14 = arith.addf %13, %12 : vector<32x128xf32>
    %c0_15 = arith.constant 0 : index
    %c0_16 = arith.constant 0 : index
    %15 = vector.load %arg6[%c0_15, %c0_16] : memref<32x128xf32, #tpu.memory_space<vmem>>, vector<32x128xf32>
    tpu.vector_store %arg6[%c0_15, %c0_16], %14 {strides = array<i32>} : memref<32x128xf32, #tpu.memory_space<vmem>>, vector<32x128xf32>,
    %c0_17 = arith.constant 0 : index
    %c0_18 = arith.constant 0 : index
    %16 = vector.load %arg7[%c0_17, %c0_18] : memref<32x128xf32, #tpu.memory_space<vmem>>, vector<32x128xf32>
    %17 = arith.maximumf %16, %12 : vector<32x128xf32>
    %c0_19 = arith.constant 0 : index
    %c0_20 = arith.constant 0 : index
    %18 = vector.load %arg7[%c0_19, %c0_20] : memref<32x128xf32, #tpu.memory_space<vmem>>, vector<32x128xf32>
    tpu.vector_store %arg7[%c0_19, %c0_20], %17 {strides = array<i32>} : memref<32x128xf32, #tpu.memory_space<vmem>>, vector<32x128xf32>,
    %c0_i32_21 = arith.constant 0 : i32
    %19 = arith.cmpi eq, %arg1, %c0_i32_21 : i32
    %20 = arith.extui %19 : i1 to i32
    %c0_i32_22 = arith.constant 0 : i32
    %21 = arith.cmpi ne, %20, %c0_i32_22 : i32
    scf.if %21 {
      %c0_23 = arith.constant 0 : index
      %c0_24 = arith.constant 0 : index
      %22 = vector.load %arg6[%c0_23, %c0_24] : memref<32x128xf32, #tpu.memory_space<vmem>>, vector<32x128xf32>
      %cst = arith.constant dense<0.000000e+00> : vector<32xf32>
      %23 = vector.multi_reduction <add>, %22, %cst [1] : vector<32x128xf32> to vector<32xf32>
      %24 = vector.shape_cast %23 : vector<32xf32> to vector<32x1xf32>
      %cst_25 = arith.constant 3.906250e-03 : f32
      %25 = vector.broadcast %cst_25 : f32 to vector<32x1xf32>
      %26 = arith.mulf %24, %25 : vector<32x1xf32>
      %c0_26 = arith.constant 0 : index
      %c0_27 = arith.constant 0 : index
      %27 = vector.load %arg7[%c0_26, %c0_27] : memref<32x128xf32, #tpu.memory_space<vmem>>, vector<32x128xf32>
      %cst_28 = arith.constant dense<0xFF800000> : vector<32xf32>
      %28 = vector.multi_reduction <maximumf>, %27, %cst_28 [1] : vector<32x128xf32> to vector<32xf32>
      %29 = vector.shape_cast %28 : vector<32xf32> to vector<32x1xf32>
      %c0_29 = arith.constant 0 : index
      %c0_30 = arith.constant 0 : index
      %30 = vector.load %arg3[%c0_29, %c0_30] : memref<2x32xf32, #tpu.memory_space<vmem>>, vector<2x32xf32>
      %c0_31 = arith.constant 0 : index
      %c0_32 = arith.constant 0 : index
      %31 = vector.load %arg4[%c0_31, %c0_32] : memref<32x2xf32, #tpu.memory_space<vmem>>, vector<32x2xf32>
      %cst_33 = arith.constant dense<0.000000e+00> : vector<2x1xf32>
      %32 = tpu.matmul %30, %26, %cst_33 {dimension_numbers = #tpu.dot_dimension_numbers<[1], [0], [0], [1], [0, 0, 1, 1], [], []>} : vector<2x32xf32>, vector<32x1xf32>, vector<2x1xf32> -> vector<2x1xf32>
      %cst_34 = arith.constant 0.000000e+00 : f32
      %33 = vector.broadcast %cst_34 : f32 to vector<2x1xf32>
      %34 = arith.maximumf %32, %33 : vector<2x1xf32>
      %cst_35 = arith.constant dense<0.000000e+00> : vector<2x1xf32>
      %35 = tpu.matmul %30, %29, %cst_35 {dimension_numbers = #tpu.dot_dimension_numbers<[1], [0], [0], [1], [0, 0, 1, 1], [], []>} : vector<2x32xf32>, vector<32x1xf32>, vector<2x1xf32> -> vector<2x1xf32>
      %cst_36 = arith.constant 0.000000e+00 : f32
      %36 = vector.broadcast %cst_36 : f32 to vector<2x1xf32>
      %37 = arith.maximumf %35, %36 : vector<2x1xf32>
      %38 = arith.addf %34, %37 : vector<2x1xf32>
      %cst_37 = arith.constant dense<0.000000e+00> : vector<32x1xf32>
      %39 = tpu.matmul %31, %38, %cst_37 {dimension_numbers = #tpu.dot_dimension_numbers<[1], [0], [0], [1], [0, 0, 1, 1], [], []>} : vector<32x2xf32>, vector<2x1xf32>, vector<32x1xf32> -> vector<32x1xf32>
      %40 = arith.negf %39 : vector<32x1xf32>
      %41 = math.exp %40 : vector<32x1xf32>
      %cst_38 = arith.constant 1.000000e+00 : f32
      %42 = vector.broadcast %cst_38 : f32 to vector<32x1xf32>
      %43 = arith.addf %42, %41 : vector<32x1xf32>
      %44 = arith.divf %42, %43 : vector<32x1xf32>
      %c0_39 = arith.constant 0 : index
      %c0_40 = arith.constant 0 : index
      %c0_41 = arith.constant 0 : index
      %45 = vector.load %arg5[%c0_39, %c0_40, %c0_41] : memref<1x32x1xf32, #tpu.memory_space<vmem>>, vector<1x32x1xf32>
      %46 = vector.shape_cast %45 : vector<1x32x1xf32> to vector<32x1xf32>
      %47 = vector.shape_cast %44 : vector<32x1xf32> to vector<1x32x1xf32>
      tpu.vector_store %arg5[%c0_39, %c0_40, %c0_41], %47 {strides = array<i32>} : memref<1x32x1xf32, #tpu.memory_space<vmem>>, vector<1x32x1xf32>,
    } else {
    }
    return
  }
  func.func @transform_0(%arg0: i32, %arg1: i32) -> (i32, i32, i32) {
    %c0_i32 = arith.constant 0 : i32
    %c0_i32_0 = arith.constant 0 : i32
    return %arg0, %c0_i32, %arg1 : i32, i32, i32
  }
  func.func @transform_1(%arg0: i32, %arg1: i32) -> (i32, i32) {
    %c0_i32 = arith.constant 0 : i32
    %c0_i32_0 = arith.constant 0 : i32
    %c0_i32_1 = arith.constant 0 : i32
    return %c0_i32, %c0_i32_0 : i32, i32
  }
  func.func @transform_2(%arg0: i32, %arg1: i32) -> (i32, i32) {
    %c0_i32 = arith.constant 0 : i32
    %c0_i32_0 = arith.constant 0 : i32
    %c0_i32_1 = arith.constant 0 : i32
    return %c0_i32, %c0_i32_0 : i32, i32
  }
  func.func @transform_3(%arg0: i32, %arg1: i32) -> (i32, i32, i32) {
    %c0_i32 = arith.constant 0 : i32
    %c0_i32_0 = arith.constant 0 : i32
    %c0_i32_1 = arith.constant 0 : i32
    return %arg0, %c0_i32, %c0_i32_0 : i32, i32, i32
  }
}

</mosaic_0001>

<bundles_post_ra>
// kernel: tpu_custom_call.1
= control target key start
LH: loop header
LB: loop body
LE: loop exit
PB: predicated region body
PF: predicated region fallthrough
CT: control target
= control target key end

     0   :  { %8 = vsyncpa [#allocation5], 0  ;;  %s1036_s0 = inlined_call_operand.hbm [shape: f32[2,32,256], index: 0, kind: input, shape index: {}]   ;;  %s1037_s1 = inlined_call_operand.vmem [shape: f32[2,32], index: 1, kind: input, shape index: {}]   ;;  %s1038_s2 = inlined_call_operand.vmem [shape: f32[32,2], index: 2, kind: input, shape index: {}]   ;;  %s1039_s3 = inlined_call_operand.vmem [shape: f32[2,32,1], index: 3, kind: output, shape index: {}]  }
   0x1   :  { %10 = vsyncpa [#allocation5 + $0x1], 0  ;;  %s921_s12 = smov 0   ;;  %s923_s13 = smov 0  }
   0x2   :  { %s925_s14 = smov 0   ;;  %s927_s15 = smov 0  }
   0x3   :  { %s929_s16 = smov 0   ;;  %s931_s17 = smov 0  }
   0x4 LB: > { %s668_s18 = sadd.s32 4294967295, %s894_s17   ;;  %s28_s19 = sadd.s32 1, %s890_s16  ;;  %s894_s17 = sphi %s931_s17, %s16_s17   ;;  %s890_s16 = sphi %s929_s16, %s1047_s16   ;;  %s886_s15 = sphi %s927_s15, %s1046_s15   ;;  %s882_s14 = sphi %s925_s14, %s1045_s14   ;;  %s878_s13 = sphi %s923_s13, %s1044_s13   ;;  %s874_s12 = sphi %s921_s12, %s1043_s12  }
   0x5   : > { %p30_p0 = scmp.ge.s32.totalorder %s28_s19, 2  ;;  %s37_s20 = sadd.s32 1, %s882_s14 }
   0x6   : > { %p44_p1 = scmp.ne.s32.totalorder %s882_s14, %s878_s13  ;;  %p45_p2 = scmp.eq.s32.totalorder %s894_s17, 0 }
   0x7   : > { %s1049_s19 = smov (%p30_p0, %s28_s19), 0  ;;  %p50_p4 = scmp.ne.s32.totalorder %s878_s13, %s874_s12 }
   0x8   : > { %p957_p3 = por %p45_p2, %p44_p1  ;;  %s32_s22 = ssub.s32 %s890_s16, %s1049_s19 }
   0x9   : > { %p51_p5 = scmp.eq.s32.totalorder %s668_s18, 0  ;;  %p35_p6 = scmp.eq.s32.totalorder %s32_s22, 0 }
   0xa   : > { %p747_p8 = scmp.lt.s32.totalorder %s894_s17, 2  ;;  %s148_s25 = sand.u32 1, %s882_s14  }
   0xb   : > { %p964_p7 = por %p51_p5, %p50_p4  ;;  %s692_s26 = sshll.u32 %s890_s16, 10 }
   0xc   : > { %s970_s24 = scalar_select %p35_p6, %s882_s14, %s37_s20  }
   0xd   : > { %s672_s27 = sshll.u32 %s148_s25, 6  ;;  %s160_s30 = scalar_lea.hbm %s1036_s0, %s692_s26 }
   0xe   : > { %s152_s4 = scalar_lea.vmem [#allocation4], %s672_s27  ;;  %p979_p9 = pnand %p747_p8, %p957_p3 }
   0xf   : > { %s161_s5 = sshll.u32 %s152_s4, 4  ;;  %s149_s7 = scalar_lea.sflag [#allocation5], %s148_s25  ;;  %s162_s5 = int_to_ptr.vmem [resolvable:$true] %s161_s5 }
  0x10   : > { %p818_p10 = pneg %p979_p9  ;;  %s829_s8 = scalar_lea.vmem %s162_s5, 1024 }
  0x11   : > { %p830_p11 = scmp.ne.s32.totalorder %s162_s5, %s829_s8  ;;  %s896_s9 = smov [#allocation4]  }
  0x12   : > { %s834_s10 = sshll.u32 %s896_s9, 4  ;;  %s835_s10 = int_to_ptr.vmem [resolvable:$false] %s834_s10 }
  0x13   : > { %p832_p12 = pnand %p830_p11, %p818_p10  ;;  %s836_s11 = scalar_lea.vmem %s835_s10, 2048 }
  0x14   : > { %p837_p0 = scmp.lt.s32.totalorder %s162_s5, %s835_s10  ;;  %p838_p1 = scmp.lt.s32.totalorder %s836_s11, %s829_s8 }
  0x15   : > { %p833_p13 = pneg %p832_p12 }
  0x16   : > { %p839_p2 = por %p838_p1, %p837_p0 }
  0x18   : > { %p840_p3 = pnand %p839_p2, %p833_p13 }
  0x1a   : > { %843 = shalt.err (!%p840_p3)
}
  0x1b   : > { %s897_s12 = smov 256   ;;  %s898_s18 = smov 16  }
  0x1c   : > { %746 = dma.hbm_to_vmem [thread:$0]  (!%p979_p9), %s160_s30, 1024, %s162_s5, %s149_s7, %s897_s12, %s897_s12, %s898_s18  }
  0x1d   : > { %p675_p4 = scmp.ge.s32.totalorder %s894_s17, 1  ;;  %p169_p5 = scmp.lt.s32.totalorder %s894_s17, 3 }
  0x1f   : > { %p170_p6 = pnand %p675_p4, %p169_p5 }
  0x20   : > { %s175_s20 = sand.u32 (!%p170_p6), 1, %s878_s13  }
  0x21   : > { %173 = sbr.rel (%p170_p6) target bundleno = 623 (0x26f), region = 32  ;;  %s676_s21 = sshll.u32 (!%p170_p6), %s175_s20, 6 }
  0x22   : > { %s176_s22 = scalar_lea.sflag (!%p170_p6), [#allocation5], %s175_s20  ;;  %s179_s25 = scalar_lea.vmem (!%p170_p6), [#allocation4], %s676_s21 }
  0x26   : > { %869 = dma.done.wait (%p964_p7), %s176_s22, 1024  }
  0x27   : > { %871 = vsyncadd (%p964_p7), %s176_s22, 4294966272  ;;  %v223_v0 = vld [vmem:[%s179_s25 + $0x30] sm:$0xff]  ;;  %v251_v1 = vld [vmem:[%s179_s25 + $0x38] sm:$0xff]  ;;  %v899_v16 = vmov 0.0   ;;  %vm900_vm0 = vmmov 0   ;;  %vm312_vm1 = vcmask 261120  }
  0x28   : > { %v222_v2 = vld [vmem:[%s179_s25 + $0x20] sm:$0xff]  ;;  %v259_v3 = vadd.f32 %v251_v1, %v223_v0  ;;  %v271_v4 = vmax.f32 %v223_v0, %v251_v1  ;;  %v250_v5 = vld [vmem:[%s179_s25 + $0x28] sm:$0xff]  ;;  %v221_v6 = vld [vmem:[%s179_s25 + $0x10] sm:$0xff]  ;;  %709 = vmatprep.subr.mxu0 %v899_v16  ;;  %720 = vmatprep.subr.mxu1 %v899_v16  ;;  %vm459_vm2 = vcmask 15360   ;;  %vm472_vm3 = vcmask 1041408   ;;  %p203_p7 = scmp.lt.s32.totalorder %s886_s15, 1 }
  0x29   : > { %v249_v7 = vld [vmem:[%s179_s25 + $0x18] sm:$0xff]  ;;  %v258_v8 = vadd.f32 %v250_v5, %v222_v2  ;;  %v220_v10 = vld [vmem:[%s179_s25] sm:$0xff]  ;;  %v248_v11 = vld [vmem:[%s179_s25 + $0x8] sm:$0xff]  ;;  %v270_v12 = vmax.f32 %v222_v2, %v250_v5  ;;  %717 = vmatprep.mubr.msk.f32.mxu0 %vm900_vm0, %v899_v16  ;;  %728 = vmatprep.mubr.msk.f32.mxu1 %vm900_vm0, %v899_v16  ;;  %vm585_vm4 = vcmask 7168  }
  0x2a   : > { %289 = vadd.xlane.f32.xlu0 %v259_v3  ;;  %305 = vmax.xlane.f32.xlu1 %v271_v4  ;;  %v257_v9 = vadd.f32 %v249_v7, %v221_v6  ;;  %v256_v13 = vadd.f32 %v248_v11, %v220_v10  ;;  %v269_v14 = vmax.f32 %v221_v6, %v249_v7  ;;  %v307_v27 = vld [vmem:[%s1037_s1] sm:$0x3]  ;;  %v310_v31 = vld [vmem:[%s1038_s2 + $0x10] sm:$0xff]  ;;  %v309_v39 = vld [vmem:[%s1038_s2 + $0x8] sm:$0xff]  ;;  %s1051_s15 = smov (!%p203_p7, %s886_s15), 1 }
  0x2b   : > { %v268_v15 = vmax.f32 %v220_v10, %v248_v11  ;;  %v308_v30 = vld [vmem:[%s1038_s2] sm:$0xff]  ;;  %v311_v40 = vld [vmem:[%s1038_s2 + $0x18] sm:$0xff]  ;;  %s693_s8 = sshll.u32 %s1051_s15, 5 }
  0x2c   : > { %s207_s11 = scalar_lea.vmem %s1039_s3, %s693_s8 }
  0x2e   : > { %287 = vadd.xlane.f32.xlu0 %v258_v8  ;;  %285 = vadd.xlane.f32.xlu1 %v257_v9 }
  0x32   : > { %303 = vmax.xlane.f32.xlu0 %v270_v12  ;;  %283 = vadd.xlane.f32.xlu1 %v256_v13 }
  0x36   : > { %301 = vmax.xlane.f32.xlu0 %v269_v14  ;;  %299 = vmax.xlane.f32.xlu1 %v268_v15 }
  0xb3   : > { %v290_v17 = vpop.xlane.xlu0 %289  ;;  %v306_v18 = vpop.xlane.xlu1 %305 }
  0xb4   : > { %v294_v19 = vmul.f32 0.00390625, %v290_v17  ;;  %721 = vmatpush3.msra.mxu1 %v306_v18 }
  0xb5   : > { %722 = vmatprep.subr.mxu1 %v899_v16 }
  0xb6   : > { %710 = vmatpush3.msra.mxu0 %v294_v19 }
  0xb7   : > { %v288_v20 = vpop.xlane.xlu0 %287  ;;  %711 = vmatprep.subr.mxu0 %v899_v16  ;;  %v286_v21 = vpop.xlane.xlu1 %285 }
  0xb8   : > { %v293_v22 = vmul.f32 0.00390625, %v288_v20  ;;  %v292_v23 = vmul.f32 0.00390625, %v286_v21 }
  0xba   : > { %712 = vmatpush3.msra.mxu0 %v293_v22 }
  0xbb   : > { %713 = vmatprep.subr.mxu0 %v899_v16  ;;  %v304_v24 = vpop.xlane.xlu0 %303  ;;  %v284_v25 = vpop.xlane.xlu1 %283 }
  0xbc   : > { %714 = vmatpush3.msra.mxu0 %v292_v23  ;;  %723 = vmatpush3.msra.mxu1 %v304_v24  ;;  %v291_v26 = vmul.f32 0.00390625, %v284_v25 }
  0xbd   : > { %724 = vmatprep.subr.mxu1 %v899_v16  ;;  %715 = vmatprep.subr.mxu0 %v899_v16 }
  0xbe   : > { %716 = vmatpush3.msra.mxu0 %v291_v26 }
  0xbf   : > { %v302_v28 = vpop.xlane.xlu0 %301  ;;  %718 = vmatmul.mubr.msk.f32.vlgmr.msra.gmra.mxu0 %vm312_vm1, %v307_v27  ;;  %v300_v29 = vpop.xlane.xlu1 %299 }
  0xc0   : > { %725 = vmatpush3.msra.mxu1 %v302_v28  ;;  %733 = vmatprep.mubr.msk.f32.mxu0 %vm459_vm2, %v308_v30 }
  0xc1   : > { %726 = vmatprep.subr.mxu1 %v899_v16 }
  0xc2   : > { %727 = vmatpush3.msra.mxu1 %v300_v29 }
  0xc3   : > { %729 = vmatmul.mubr.msk.f32.vlgmr.msra.gmra.mxu1 %vm312_vm1, %v307_v27 }
  0xc4   : > { %736 = vmatprep.mubr.msk.f32.mxu1 %vm459_vm2, %v310_v31 }
 0x17f   : > { %v382_v32 = vpop.f32.mrf.mxu0 }
 0x180   : > { %v386_v34 = vmax.f32 %v382_v32, 0.0 }
 0x181   : > { %v719_v33 = vpop.f32.mrf.mxu0 }
 0x183   : > { %v453_v35 = vpop.f32.mrf.mxu1 }
 0x184   : > { %v457_v36 = vmax.f32 %v453_v35, 0.0 }
 0x185   : > { %v730_v37 = vpop.f32.mrf.mxu1 }
 0x186   : > { %v458_v38 = vadd.f32 %v457_v36, %v386_v34 }
 0x188   : > { %731 = vmatprep.subr.msk.mxu0 %vm472_vm3, %v458_v38  ;;  %739 = vmatprep.subr.msk.mxu1 %vm472_vm3, %v458_v38 }
 0x189   : > { %732 = vmatpush3.msk.msra.mxu0 %vm472_vm3, %v458_v38  ;;  %740 = vmatpush3.msk.msra.mxu1 %vm472_vm3, %v458_v38 }
 0x18a   : > { %734 = vmatmul.mubr.msk.f32.vlgmr.msra.gmra.mxu0 %vm459_vm2, %v309_v39  ;;  %737 = vmatmul.mubr.msk.f32.vlgmr.msra.gmra.mxu1 %vm459_vm2, %v311_v40 }
 0x24a   : > { %v735_v41 = vpop.f32.mrf.mxu0  ;;  %v738_v42 = vpop.f32.mrf.mxu1 }
 0x24b   : > { %v687_v43 = vmul.f32 -1.442695, %v735_v41  ;;  %v689_v44 = vmul.f32 -1.442695, %v738_v42 }
 0x24c   : > { %v542_v45 = vpop.f32.mrf.mxu0  ;;  %v552_v46 = vpop.f32.mrf.mxu1 }
 0x24d   : > { %800 = vpow2.f32 %v687_v43  ;;  %v686_v47 = vmul.f32 -1.442695, %v542_v45  ;;  %v688_v48 = vmul.f32 -1.442695, %v552_v46 }
 0x24e   : > { %802 = vpow2.f32 %v689_v44 }
 0x24f   : > { %804 = vpow2.f32 %v686_v47 }
 0x250   : > { %806 = vpow2.f32 %v688_v48 }
 0x25a   : > { %v801_v49 = vpop.eup %800 }
 0x25b   : > { %v803_v50 = vpop.eup %802  ;;  %v574_v51 = vadd.f32 1.0, %v801_v49 }
 0x25c   : > { %v805_v52 = vpop.eup %804  ;;  %v576_v53 = vadd.f32 1.0, %v803_v50 }
 0x25d   : > { %v807_v54 = vpop.eup %806  ;;  %808 = vrcp.f32 %v574_v51  ;;  %v573_v55 = vadd.f32 1.0, %v805_v52 }
 0x25e   : > { %810 = vrcp.f32 %v576_v53  ;;  %v575_v56 = vadd.f32 1.0, %v807_v54 }
 0x25f   : > { %812 = vrcp.f32 %v573_v55 }
 0x260   : > { %814 = vrcp.f32 %v575_v56 }
 0x26a   : > { %v809_v57 = vpop.eup %808 }
 0x26b   : > { %v811_v58 = vpop.eup %810  ;;  %587 = vst.msk [vmem:[%s207_s11 + $0x8] sm:$0xff] %vm585_vm4, %v809_v57 }
 0x26c   : > { %v813_v59 = vpop.eup %812  ;;  %589 = vst.msk [vmem:[%s207_s11 + $0x18] sm:$0xff] %vm585_vm4, %v811_v58 }
 0x26d   : > { %v815_v60 = vpop.eup %814  ;;  %586 = vst.msk [vmem:[%s207_s11] sm:$0xff] %vm585_vm4, %v813_v59 }
 0x26e   : > { %588 = vst.msk [vmem:[%s207_s11 + $0x10] sm:$0xff] %vm585_vm4, %v815_v60 }
 0x26f PF: > { %s16_s17 = sadd.s32 1, %s894_s17   ;;  %s1043_s12 = smov %s878_s13 }
 0x270   : > { %p13_p8 = scmp.ge.s32.totalorder %s16_s17, 4   ;;  %s1044_s13 = smov %s882_s14 }
 0x271   : > { %s1045_s14 = smov %s970_s24  ;;  %s1046_s15 = smov %s890_s16 }
 0x272   : > { %s1047_s16 = smov %s1049_s19  ;;  %15 = sbr.rel (!%p13_p8) target bundleno = 4 (0x4), region = 80 }
 0x277   :  { %611 = vsyncpa [#allocation5], 1 }
 0x278   :  { %613 = vsyncpa [#allocation5 + $0x1], 1 }

</bundles_post_ra>
